<compile_context>
chip_gen: v7x
topology: tpu7x:2x2x1
jax: 0.10.0
libtpu: 0.0.40
codegen_flags: <defaults>
</compile_context>

<pallas_src>
import jax
import jax.numpy as jnp
from jax.experimental import pallas as pl
from jax.experimental.pallas import tpu as pltpu

LANE = 128
SUBLANE_BF16 = 16
HIDDEN1 = 128
HIDDEN2 = 64


def _round_up(n, m):
    return ((n + m - 1) // m) * m


def _mlp_kernel(x_ref, w1_ref, b1_ref, w2_ref, b2_ref, w3_ref, b3_ref, o_ref):
    # Layer 1: Linear + ReLU (bf16 operands -> f32 accumulation on the MXU).
    h1 = jnp.dot(x_ref[...], w1_ref[...], preferred_element_type=jnp.float32)
    h1 = jnp.maximum(h1 + b1_ref[...], 0.0)
    # Layer 2: Linear + ReLU.
    h2 = jnp.dot(h1.astype(jnp.bfloat16), w2_ref[...],
                 preferred_element_type=jnp.float32)
    h2 = jnp.maximum(h2 + b2_ref[...], 0.0)
    # fc: Linear (no nonlinearity). Store in o_ref.dtype (bf16 by default:
    # halves the lane-padded output write of this HBM-bound kernel).
    out = jnp.dot(h2.astype(jnp.bfloat16), w3_ref[...],
                  preferred_element_type=jnp.float32)
    o_ref[...] = (out + b3_ref[...]).astype(o_ref.dtype)


def pack_params(params):
    """Zero-pad weights/biases to lane-aligned (multiple-of-128) shapes and
    cast matmul operands to bf16.  Zero padding is exact: ReLU(0) = 0 and
    zero rows/cols contribute nothing to the matmuls."""
    w1, b1 = params["w1"], params["b1"]
    w2, b2 = params["w2"], params["b2"]
    w3, b3 = params["w3"], params["b3"]
    d, h1 = w1.shape
    h2 = w2.shape[1]
    c = w3.shape[1]
    dp = _round_up(d, LANE)
    h1p = _round_up(h1, LANE)
    h2p = _round_up(h2, LANE)
    cp = _round_up(c, LANE)

    def pad2(a, rows, cols):
        return jnp.pad(a, ((0, rows - a.shape[0]), (0, cols - a.shape[1])))

    return {
        "w1": pad2(w1, dp, h1p).astype(jnp.bfloat16),
        "b1": pad2(b1, 1, h1p).astype(jnp.float32),
        "w2": pad2(w2, h1p, h2p).astype(jnp.bfloat16),
        "b2": pad2(b2, 1, h2p).astype(jnp.float32),
        "w3": pad2(w3, h2p, cp).astype(jnp.bfloat16),
        "b3": pad2(b3, 1, cp).astype(jnp.float32),
    }


def preprocess(imgs, scale, d_padded):
    """|fftshift(fft2(img))| ** scale, flattened, feature-padded to `d_padded`
    and cast to bf16 in the same post-FFT elementwise pass.  Jitted together
    with the kernel call, this avoids a standalone pad/cast HBM round-trip
    over x (the single largest traffic saving at large batch)."""
    B = imgs.shape[0]
    fft = jnp.fft.fftshift(jnp.fft.fft2(imgs), axes=(-2, -1))
    x = (jnp.abs(fft) ** scale).reshape(B, -1)
    d = x.shape[1]
    if d_padded > d:
        x = jnp.pad(x, ((0, 0), (0, d_padded - d)))
    return x.astype(jnp.bfloat16)


def _choose_batch_tile(batch, max_tile, min_steps=2):
    """Batch tile: a multiple of 16 (bf16 sublane quantum), <= batch, capped
    by max_tile.  Splits into >= min_steps grid steps when batch >= 32 so both
    v7x TensorCores get work; never pads the batch by a full tile (the ragged
    last block is handled by Pallas)."""
    if batch <= SUBLANE_BF16:
        return SUBLANE_BF16
    floor16 = (batch // SUBLANE_BF16) * SUBLANE_BF16
    tb = min(max_tile, floor16)
    if pl.cdiv(batch, tb) < min_steps and batch >= 2 * SUBLANE_BF16:
        tb = min(tb, _round_up(pl.cdiv(batch, min_steps), SUBLANE_BF16))
    return tb


def onn_forward(x, packed, num_classes, *, max_batch_tile=1024,
                out_dtype=jnp.bfloat16):
    """x: (B, D) activations, ideally already bf16 and feature-padded to a
    multiple of 128 by `preprocess` (then no extra HBM pass happens here).
    Returns (B, num_classes) logits in `out_dtype`."""
    w1, b1 = packed["w1"], packed["b1"]
    w2, b2 = packed["w2"], packed["b2"]
    w3, b3 = packed["w3"], packed["b3"]
    dp, h1p = w1.shape
    h2p = w2.shape[1]
    cp = w3.shape[1]

    B, D = x.shape
    assert D <= dp and num_classes <= cp

    # Slow-path fixups only if the caller bypassed `preprocess`.
    if D < dp:
        x = jnp.pad(x, ((0, 0), (0, dp - D)))
    if x.dtype != jnp.bfloat16:
        x = x.astype(jnp.bfloat16)

    # Tiny batches: pad up to one 16-row tile (negligible).  Larger batches:
    # no padding — the last grid step is a ragged block; its garbage tail rows
    # stay confined to output rows that are sliced off below (rows are
    # independent through every matmul, so no cross-row contamination).
    if B < SUBLANE_BF16:
        x = jnp.pad(x, ((0, SUBLANE_BF16 - B), (0, 0)))
    bp = max(B, SUBLANE_BF16)

    tb = _choose_batch_tile(bp, max_batch_tile)
    grid = (pl.cdiv(bp, tb),)

    def resident(shape):
        # Constant block index -> weights/biases stay VMEM-resident across all
        # grid steps (DMA'd once).
        return pl.BlockSpec(shape, lambda i: (0, 0))

    # Explicit VMEM budget for the enlarged batch tile: x + out double buffers,
    # resident weights/biases (counted twice for buffer headroom), f32
    # intermediates, plus slack.  Never below the 32 MiB scoped default, never
    # above v7x's 64 MiB physical VMEM.
    vmem_bytes = (
        3 * tb * dp * 2                                   # x (bf16) buffers
        + 3 * tb * cp * 2                                 # out (bf16) buffers
        + 2 * (dp * h1p + h1p * h2p + h2p * cp) * 2       # weights (bf16)
        + 4 * (h1p + h2p + cp) * 4                        # biases (f32)
        + 2 * tb * (h1p + h2p) * 4                        # f32 intermediates
        + (2 << 20)                                       # misc slack
    )
    vmem_limit = int(min(max(vmem_bytes, 32 << 20), 64 << 20))

    flops = 2 * bp * (dp * h1p + h1p * h2p + h2p * cp)
    bytes_accessed = int(
        bp * dp * 2
        + (dp * h1p + h1p * h2p + h2p * cp) * 2
        + (h1p + h2p + cp) * 4
        + bp * cp * jnp.dtype(out_dtype).itemsize
    )

    out_p = pl.pallas_call(
        _mlp_kernel,
        out_shape=jax.ShapeDtypeStruct((bp, cp), out_dtype),
        grid=grid,
        in_specs=[
            pl.BlockSpec((tb, dp), lambda i: (i, 0)),   # x: streamed over batch
            resident(w1.shape), resident(b1.shape),
            resident(w2.shape), resident(b2.shape),
            resident(w3.shape), resident(b3.shape),
        ],
        out_specs=pl.BlockSpec((tb, cp), lambda i: (i, 0)),
        compiler_params=pltpu.CompilerParams(
            dimension_semantics=("parallel",),   # megacore / v7x dual-TC shard
            vmem_limit_bytes=vmem_limit,
        ),
        cost_estimate=pl.CostEstimate(
            flops=int(flops), transcendentals=0, bytes_accessed=bytes_accessed),
    )(x, w1, b1, w2, b2, w3, b3)

    # Drop the batch tail and the lane padding of the class dimension.
    return out_p[:B, :num_classes]


def init_params(key, input_dim, num_classes):
    """Deterministic synthetic parameters (PyTorch-Linear-style uniform init)."""
    ks = jax.random.split(key, 6)

    def lin(kw, kb, fan_in, fan_out):
        bound = 1.0 / jnp.sqrt(fan_in)
        # stored as (in, out): y = x @ W + b  ==  torch's x @ W.T + b
        w = jax.random.uniform(kw, (fan_in, fan_out), jnp.float32, -bound, bound)
        b = jax.random.uniform(kb, (1, fan_out), jnp.float32, -bound, bound)
        return w, b

    w1, b1 = lin(ks[0], ks[1], input_dim, HIDDEN1)
    w2, b2 = lin(ks[2], ks[3], HIDDEN1, HIDDEN2)
    w3, b3 = lin(ks[4], ks[5], HIDDEN2, num_classes)
    return {"w1": w1, "b1": b1, "w2": w2, "b2": b2, "w3": w3, "b3": b3}


if __name__ == "__main__":
    key = jax.random.PRNGKey(0)
    k_img, k_param = jax.random.split(key)

    # small shapes: batch=2, 16x16 "images", 10 classes
    B, H, W = 2, 16, 16
    num_classes = 10
    scale = 3

    imgs = jax.random.uniform(k_img, (B, H, W), jnp.float32)
    input_dim = H * W
    dp = _round_up(input_dim, LANE)

    params = init_params(k_param, input_dim, num_classes)
    packed = pack_params(params)

    @jax.jit
    def run(images):
        x = preprocess(images, scale, dp)          # bf16, feature-padded
        return onn_forward(x, packed, num_classes)

    out = jax.block_until_ready(run(imgs))
    assert out.shape == (B, num_classes)
    out_f32 = out.astype(jnp.float32)

    # Plain-JAX reference input (f32, unpadded), same math as the torch script.
    x_flat = (jnp.abs(jnp.fft.fftshift(jnp.fft.fft2(imgs), axes=(-2, -1)))
              ** scale).reshape(B, -1).astype(jnp.float32)

    # (1) Matched reference: same bf16-operand / f32-accumulation math.
    def ref_matched(xf, p):
        xb = xf.astype(jnp.bfloat16)
        h1 = jnp.maximum(
            jnp.dot(xb, p["w1"].astype(jnp.bfloat16),
                    preferred_element_type=jnp.float32) + p["b1"], 0.0)
        h2 = jnp.maximum(
            jnp.dot(h1.astype(jnp.bfloat16), p["w2"].astype(jnp.bfloat16),
                    preferred_element_type=jnp.float32) + p["b2"], 0.0)
        return jnp.dot(h2.astype(jnp.bfloat16), p["w3"].astype(jnp.bfloat16),
                       preferred_element_type=jnp.float32) + p["b3"]

    # (2) Full-f32 reference: catches precision loss from the bf16 casts.
    def ref_f32(xf, p):
        h1 = jnp.maximum(xf @ p["w1"] + p["b1"], 0.0)
        h2 = jnp.maximum(h1 @ p["w2"] + p["b2"], 0.0)
        return h2 @ p["w3"] + p["b3"]

    ref_m = ref_matched(x_flat, params)
    ref_f = ref_f32(x_flat, params)

    err_m = jnp.max(jnp.abs(out_f32 - ref_m)) / (jnp.max(jnp.abs(ref_m)) + 1e-6)
    err_f = jnp.max(jnp.abs(out_f32 - ref_f)) / (jnp.max(jnp.abs(ref_f)) + 1e-6)
    assert err_m < 1e-2, f"matched-math relative error too large: {err_m}"
    assert err_f < 5e-2, f"f32-reference relative error too large: {err_f}"

    print("KERNEL_OK")
</pallas_src>

<mosaic_0001>
module attributes {stable_mosaic.version = 11 : i64} {
  func.func @_mlp_kernel(%arg0: i32, %arg1: memref<16x256xbf16, #tpu.memory_space<vmem>>, %arg2: memref<256x128xbf16, #tpu.memory_space<vmem>>, %arg3: memref<1x128xf32, #tpu.memory_space<vmem>>, %arg4: memref<128x128xbf16, #tpu.memory_space<vmem>>, %arg5: memref<1x128xf32, #tpu.memory_space<vmem>>, %arg6: memref<128x128xbf16, #tpu.memory_space<vmem>>, %arg7: memref<1x128xf32, #tpu.memory_space<vmem>>, %arg8: memref<16x128xbf16, #tpu.memory_space<vmem>>) attributes {dimension_semantics = [#tpu.dimension_semantics<parallel>], iteration_bounds = array<i64: 1>, scalar_prefetch = 0 : i64, scratch_operands = 0 : i64, tpu.core_type = #tpu.core_type<tc>, window_params = [{transform_indices = @transform_0, window_bounds = array<i64: 16, 256>}, {pipeline_mode = #tpu.pipeline_mode<synchronous>, transform_indices = @transform_1, window_bounds = array<i64: 256, 128>}, {pipeline_mode = #tpu.pipeline_mode<synchronous>, transform_indices = @transform_2, window_bounds = array<i64: 1, 128>}, {pipeline_mode = #tpu.pipeline_mode<synchronous>, transform_indices = @transform_3, window_bounds = array<i64: 128, 128>}, {pipeline_mode = #tpu.pipeline_mode<synchronous>, transform_indices = @transform_4, window_bounds = array<i64: 1, 128>}, {pipeline_mode = #tpu.pipeline_mode<synchronous>, transform_indices = @transform_5, window_bounds = array<i64: 128, 128>}, {pipeline_mode = #tpu.pipeline_mode<synchronous>, transform_indices = @transform_6, window_bounds = array<i64: 1, 128>}, {transform_indices = @transform_7, window_bounds = array<i64: 16, 128>}]} {
    %c0 = arith.constant 0 : index
    %c0_0 = arith.constant 0 : index
    %0 = vector.load %arg1[%c0, %c0_0] : memref<16x256xbf16, #tpu.memory_space<vmem>>, vector<16x256xbf16>
    %c0_1 = arith.constant 0 : index
    %c0_2 = arith.constant 0 : index
    %1 = vector.load %arg2[%c0_1, %c0_2] : memref<256x128xbf16, #tpu.memory_space<vmem>>, vector<256x128xbf16>
    %cst = arith.constant dense<0.000000e+00> : vector<16x128xf32>
    %2 = tpu.matmul %0, %1, %cst {dimension_numbers = #tpu.dot_dimension_numbers<[1], [0], [0], [1], [0, 0, 1, 1], [], []>} : vector<16x256xbf16>, vector<256x128xbf16>, vector<16x128xf32> -> vector<16x128xf32>
    %c0_3 = arith.constant 0 : index
    %c0_4 = arith.constant 0 : index
    %3 = vector.load %arg3[%c0_3, %c0_4] : memref<1x128xf32, #tpu.memory_space<vmem>>, vector<1x128xf32>
    %4 = vector.broadcast %3 : vector<1x128xf32> to vector<16x128xf32>
    %5 = arith.addf %2, %4 : vector<16x128xf32>
    %cst_5 = arith.constant 0.000000e+00 : f32
    %6 = vector.broadcast %cst_5 : f32 to vector<16x128xf32>
    %7 = arith.maximumf %5, %6 : vector<16x128xf32>
    %8 = arith.truncf %7 : vector<16x128xf32> to vector<16x128xbf16>
    %c0_6 = arith.constant 0 : index
    %c0_7 = arith.constant 0 : index
    %9 = vector.load %arg4[%c0_6, %c0_7] : memref<128x128xbf16, #tpu.memory_space<vmem>>, vector<128x128xbf16>
    %cst_8 = arith.constant dense<0.000000e+00> : vector<16x128xf32>
    %10 = tpu.matmul %8, %9, %cst_8 {dimension_numbers = #tpu.dot_dimension_numbers<[1], [0], [0], [1], [0, 0, 1, 1], [], []>} : vector<16x128xbf16>, vector<128x128xbf16>, vector<16x128xf32> -> vector<16x128xf32>
    %c0_9 = arith.constant 0 : index
    %c0_10 = arith.constant 0 : index
    %11 = vector.load %arg5[%c0_9, %c0_10] : memref<1x128xf32, #tpu.memory_space<vmem>>, vector<1x128xf32>
    %12 = vector.broadcast %11 : vector<1x128xf32> to vector<16x128xf32>
    %13 = arith.addf %10, %12 : vector<16x128xf32>
    %cst_11 = arith.constant 0.000000e+00 : f32
    %14 = vector.broadcast %cst_11 : f32 to vector<16x128xf32>
    %15 = arith.maximumf %13, %14 : vector<16x128xf32>
    %16 = arith.truncf %15 : vector<16x128xf32> to vector<16x128xbf16>
    %c0_12 = arith.constant 0 : index
    %c0_13 = arith.constant 0 : index
    %17 = vector.load %arg6[%c0_12, %c0_13] : memref<128x128xbf16, #tpu.memory_space<vmem>>, vector<128x128xbf16>
    %cst_14 = arith.constant dense<0.000000e+00> : vector<16x128xf32>
    %18 = tpu.matmul %16, %17, %cst_14 {dimension_numbers = #tpu.dot_dimension_numbers<[1], [0], [0], [1], [0, 0, 1, 1], [], []>} : vector<16x128xbf16>, vector<128x128xbf16>, vector<16x128xf32> -> vector<16x128xf32>
    %c0_15 = arith.constant 0 : index
    %c0_16 = arith.constant 0 : index
    %19 = vector.load %arg7[%c0_15, %c0_16] : memref<1x128xf32, #tpu.memory_space<vmem>>, vector<1x128xf32>
    %20 = vector.broadcast %19 : vector<1x128xf32> to vector<16x128xf32>
    %21 = arith.addf %18, %20 : vector<16x128xf32>
    %22 = arith.truncf %21 : vector<16x128xf32> to vector<16x128xbf16>
    %c0_17 = arith.constant 0 : index
    %c0_18 = arith.constant 0 : index
    %23 = vector.load %arg8[%c0_17, %c0_18] : memref<16x128xbf16, #tpu.memory_space<vmem>>, vector<16x128xbf16>
    tpu.vector_store %arg8[%c0_17, %c0_18], %22 {strides = array<i32>} : memref<16x128xbf16, #tpu.memory_space<vmem>>, vector<16x128xbf16>,
    return
  }
  func.func @transform_0(%arg0: i32) -> (i32, i32) {
    %c0_i32 = arith.constant 0 : i32
    %c0_i32_0 = arith.constant 0 : i32
    return %arg0, %c0_i32 : i32, i32
  }
  func.func @transform_1(%arg0: i32) -> (i32, i32) {
    %c0_i32 = arith.constant 0 : i32
    %c0_i32_0 = arith.constant 0 : i32
    %c0_i32_1 = arith.constant 0 : i32
    return %c0_i32, %c0_i32_0 : i32, i32
  }
  func.func @transform_2(%arg0: i32) -> (i32, i32) {
    %c0_i32 = arith.constant 0 : i32
    %c0_i32_0 = arith.constant 0 : i32
    %c0_i32_1 = arith.constant 0 : i32
    return %c0_i32, %c0_i32_0 : i32, i32
  }
  func.func @transform_3(%arg0: i32) -> (i32, i32) {
    %c0_i32 = arith.constant 0 : i32
    %c0_i32_0 = arith.constant 0 : i32
    %c0_i32_1 = arith.constant 0 : i32
    return %c0_i32, %c0_i32_0 : i32, i32
  }
  func.func @transform_4(%arg0: i32) -> (i32, i32) {
    %c0_i32 = arith.constant 0 : i32
    %c0_i32_0 = arith.constant 0 : i32
    %c0_i32_1 = arith.constant 0 : i32
    return %c0_i32, %c0_i32_0 : i32, i32
  }
  func.func @transform_5(%arg0: i32) -> (i32, i32) {
    %c0_i32 = arith.constant 0 : i32
    %c0_i32_0 = arith.constant 0 : i32
    %c0_i32_1 = arith.constant 0 : i32
    return %c0_i32, %c0_i32_0 : i32, i32
  }
  func.func @transform_6(%arg0: i32) -> (i32, i32) {
    %c0_i32 = arith.constant 0 : i32
    %c0_i32_0 = arith.constant 0 : i32
    %c0_i32_1 = arith.constant 0 : i32
    return %c0_i32, %c0_i32_0 : i32, i32
  }
  func.func @transform_7(%arg0: i32) -> (i32, i32) {
    %c0_i32 = arith.constant 0 : i32
    %c0_i32_0 = arith.constant 0 : i32
    return %arg0, %c0_i32 : i32, i32
  }
}

</mosaic_0001>

<bundles_post_ra>
// kernel: run.1
= control target key start
LH: loop header
LB: loop body
LE: loop exit
PB: predicated region body
PF: predicated region fallthrough
CT: control target
= control target key end

     0   :  { %v622_v1 = vmov 0.0   ;;  %vm623_vm0 = vmmov 0   ;;  %s796_s1 = inlined_call_operand.vmem [shape: bf16[256,128], index: 1, kind: input, shape index: {}]   ;;  %s797_s0 = inlined_call_operand.vmem [shape: bf16[16,256], index: 0, kind: input, shape index: {}]   ;;  %s798_s3 = inlined_call_operand.vmem [shape: bf16[128,128], index: 3, kind: input, shape index: {}]   ;;  %s799_s5 = inlined_call_operand.vmem [shape: bf16[128,128], index: 5, kind: input, shape index: {}]   ;;  %s800_s2 = inlined_call_operand.vmem [shape: f32[1,128], index: 2, kind: input, shape index: {}]   ;;  %s801_s4 = inlined_call_operand.vmem [shape: f32[1,128], index: 4, kind: input, shape index: {}]   ;;  %s802_s6 = inlined_call_operand.vmem [shape: f32[1,128], index: 6, kind: input, shape index: {}]   ;;  %s803_s7 = inlined_call_operand.vmem [shape: bf16[16,128], index: 7, kind: output, shape index: {}]  }
   0x1   :  { %v587_v0 = vld [vmem:[%s796_s1 + $0x40] sm:$0xff]   ;;  %545 = vmatprep.subr.bf16.mxu1 %v622_v1  ;;  %v589_v3 = vld [vmem:[%s796_s1 + $0x48] sm:$0xff]   ;;  %v591_v5 = vld [vmem:[%s796_s1 + $0x50] sm:$0xff]   ;;  %561 = vmatprep.mubr.msk.bf16.mxu1 %vm623_vm0, %v622_v1 }
   0x2   :  { %v588_v2 = vld [vmem:[%s796_s1] sm:$0xff]   ;;  %505 = vmatprep.subr.bf16.mxu0 %v587_v0  ;;  %v590_v4 = vld [vmem:[%s796_s1 + $0x8] sm:$0xff]   ;;  %v592_v6 = vld [vmem:[%s796_s1 + $0x10] sm:$0xff]  }
   0x3   :  { %506 = vmatpush3.bf16.msra.mxu0 %v588_v2  ;;  %v593_v7 = vld [vmem:[%s796_s1 + $0x58] sm:$0xff]   ;;  %v595_v9 = vld [vmem:[%s796_s1 + $0x60] sm:$0xff]   ;;  %v597_v11 = vld [vmem:[%s796_s1 + $0x68] sm:$0xff]  }
   0x4   :  { %507 = vmatprep.subr.bf16.mxu0 %v589_v3  ;;  %v594_v8 = vld [vmem:[%s796_s1 + $0x18] sm:$0xff]   ;;  %v596_v10 = vld [vmem:[%s796_s1 + $0x20] sm:$0xff]   ;;  %v598_v12 = vld [vmem:[%s796_s1 + $0x28] sm:$0xff]  }
   0x5   :  { %v605_v13 = vld [vmem:[%s797_s0 + $0x4] ss:$8 sps:$4 sm:$0xff]   ;;  %v599_v15 = vld [vmem:[%s796_s1 + $0x70] sm:$0xff]   ;;  %v601_v18 = vld [vmem:[%s796_s1 + $0x78] sm:$0xff]  }
   0x6   :  { %v606_v14 = vld [vmem:[%s798_s3] sm:$0xff]   ;;  %206 = vmatprep.mubr.bf16.mxu0 %v605_v13  ;;  %v607_v16 = vld [vmem:[%s798_s3 + $0x8] sm:$0xff]   ;;  %v600_v17 = vld [vmem:[%s796_s1 + $0x30] sm:$0xff]  }
   0x7   :  { %508 = vmatpush3.bf16.msra.mxu0 %v590_v4  ;;  %546 = vmatpush3.bf16.msra.mxu1 %v606_v14  ;;  %v608_v19 = vld [vmem:[%s798_s3 + $0x10] sm:$0xff]   ;;  %v602_v20 = vld [vmem:[%s796_s1 + $0x38] sm:$0xff]   ;;  %v603_v22 = vld [vmem:[%s797_s0] ss:$8 sps:$4 sm:$0xff]  }
   0x8   :  { %509 = vmatprep.subr.bf16.mxu0 %v591_v5  ;;  %547 = vmatprep.subr.bf16.mxu1 %v622_v1  ;;  %v609_v21 = vld [vmem:[%s798_s3 + $0x18] sm:$0xff]   ;;  %v610_v23 = vld [vmem:[%s798_s3 + $0x20] sm:$0xff]   ;;  %v611_v24 = vld [vmem:[%s798_s3 + $0x28] sm:$0xff]  }
   0x9   :  { %v612_v25 = vld [vmem:[%s798_s3 + $0x30] sm:$0xff]   ;;  %v613_v26 = vld [vmem:[%s798_s3 + $0x38] sm:$0xff]   ;;  %v614_v27 = vld [vmem:[%s799_s5] sm:$0xff]  }
   0xa   :  { %v615_v28 = vld [vmem:[%s799_s5 + $0x8] sm:$0xff]   ;;  %v616_v29 = vld [vmem:[%s799_s5 + $0x10] sm:$0xff]   ;;  %v617_v30 = vld [vmem:[%s799_s5 + $0x18] sm:$0xff]  }
   0xb   :  { %510 = vmatpush3.bf16.msra.mxu0 %v592_v6  ;;  %548 = vmatpush3.bf16.msra.mxu1 %v607_v16  ;;  %v618_v31 = vld [vmem:[%s799_s5 + $0x20] sm:$0xff]   ;;  %v619_v32 = vld [vmem:[%s799_s5 + $0x28] sm:$0xff]   ;;  %v620_v45 = vld [vmem:[%s799_s5 + $0x30] sm:$0xff]  }
   0xc   :  { %511 = vmatprep.subr.bf16.mxu0 %v593_v7  ;;  %549 = vmatprep.subr.bf16.mxu1 %v622_v1  ;;  %v459_v34 = vld [vmem:[%s800_s2] ss:$0 sm:$0xff]  ;;  %v621_v46 = vld [vmem:[%s799_s5 + $0x38] sm:$0xff]  }
   0xd   :  { %v478_v47 = vld [vmem:[%s801_s4] ss:$0 sm:$0xff] }
   0xe   :  { %v487_v57 = vld [vmem:[%s802_s6] ss:$0 sm:$0xff] }
   0xf   :  { %512 = vmatpush3.bf16.msra.mxu0 %v594_v8  ;;  %550 = vmatpush3.bf16.msra.mxu1 %v608_v19 }
  0x10   :  { %513 = vmatprep.subr.bf16.mxu0 %v595_v9  ;;  %551 = vmatprep.subr.bf16.mxu1 %v622_v1 }
  0x13   :  { %514 = vmatpush3.bf16.msra.mxu0 %v596_v10  ;;  %552 = vmatpush3.bf16.msra.mxu1 %v609_v21 }
  0x14   :  { %515 = vmatprep.subr.bf16.mxu0 %v597_v11  ;;  %553 = vmatprep.subr.bf16.mxu1 %v622_v1 }
  0x17   :  { %516 = vmatpush3.bf16.msra.mxu0 %v598_v12  ;;  %554 = vmatpush3.bf16.msra.mxu1 %v610_v23 }
  0x18   :  { %517 = vmatprep.subr.bf16.mxu0 %v599_v15  ;;  %555 = vmatprep.subr.bf16.mxu1 %v622_v1 }
  0x1b   :  { %518 = vmatpush3.bf16.msra.mxu0 %v600_v17  ;;  %556 = vmatpush3.bf16.msra.mxu1 %v611_v24 }
  0x1c   :  { %519 = vmatprep.subr.bf16.mxu0 %v601_v18  ;;  %557 = vmatprep.subr.bf16.mxu1 %v622_v1 }
  0x1f   :  { %520 = vmatpush3.bf16.msra.mxu0 %v602_v20  ;;  %558 = vmatpush3.bf16.msra.mxu1 %v612_v25 }
  0x20   :  { %565 = vmatprep.subr.bf16.mxu0 %v622_v1  ;;  %559 = vmatprep.subr.bf16.mxu1 %v622_v1 }
  0x22   :  { %207 = vmatmul.mubr.bf16.vlgmr.msra.gmra.mrb[0].mxu0 %v603_v22 }
  0x23   :  { %560 = vmatpush3.bf16.msra.mxu1 %v613_v26  ;;  %581 = vmatprep.mubr.msk.bf16.mxu0 %vm623_vm0, %v622_v1 }
  0x24   :  { %566 = vmatpush3.bf16.msra.mxu0 %v614_v27 }
  0x25   :  { %567 = vmatprep.subr.bf16.mxu0 %v622_v1 }
  0x28   :  { %568 = vmatpush3.bf16.msra.mxu0 %v615_v28 }
  0x29   :  { %569 = vmatprep.subr.bf16.mxu0 %v622_v1 }
  0x2c   :  { %570 = vmatpush3.bf16.msra.mxu0 %v616_v29 }
  0x2d   :  { %571 = vmatprep.subr.bf16.mxu0 %v622_v1 }
  0x30   :  { %572 = vmatpush3.bf16.msra.mxu0 %v617_v30 }
  0x31   :  { %573 = vmatprep.subr.bf16.mxu0 %v622_v1 }
  0x34   :  { %574 = vmatpush3.bf16.msra.mxu0 %v618_v31 }
  0x35   :  { %575 = vmatprep.subr.bf16.mxu0 %v622_v1 }
  0x38   :  { %576 = vmatpush3.bf16.msra.mxu0 %v619_v32 }
  0x39   :  { %577 = vmatprep.subr.bf16.mxu0 %v622_v1 }
  0x3c   :  { %578 = vmatpush3.bf16.msra.mxu0 %v620_v45 }
  0x3d   :  { %579 = vmatprep.subr.bf16.mxu0 %v622_v1 }
  0x40   :  { %580 = vmatpush3.bf16.msra.mxu0 %v621_v46 }
  0xf5   :  { %v521_v33 = vpop.f32.mrb[0].mxu0 }
  0xf6   :  { %v522_v35 = vpop.f32.mrb[1].mxu0 }
  0xf7   :  { %v523_v36 = vadd.f32 %v522_v35, %v521_v33  ;;  %v524_v37 = vpop.f32.mrb[2].mxu0 }
  0xf8   :  { %v525_v38 = vpop.f32.mrb[3].mxu0 }
  0xf9   :  { %v209_v39 = vadd.f32 %v523_v36, %v459_v34  ;;  %v526_v40 = vadd.f32 %v525_v38, %v524_v37 }
  0xfb   :  { %v212_v41 = vadd.f32 %v526_v40, %v459_v34  ;;  %v215_v42 = vmax.f32 %v209_v39, 0.0 }
  0xfd   :  { %v216_v43 = vmax.f32 %v212_v41, 0.0 }
  0xff   :  { %v217_v44 = vpack.c.bf16 %v216_v43, %v215_v42 }
 0x101   :  { %562 = vmatmul.mubr.bf16.vlgmr.msra.gmra.mrb[0].mxu1 %v217_v44 }
 0x1d4   :  { %v323_v48 = vpop.f32.mrb[0].mxu1 }
 0x1d5   :  { %v324_v49 = vadd.f32 %v478_v47, %v323_v48  ;;  %v563_v50 = vpop.f32.mrb[1].mxu1 }
 0x1d6   :  { %v326_v51 = vpop.f32.mrb[2].mxu1 }
 0x1d7   :  { %v327_v52 = vadd.f32 %v478_v47, %v326_v51  ;;  %v564_v53 = vpop.f32.mrb[3].mxu1  ;;  %v330_v54 = vmax.f32 %v324_v49, 0.0 }
 0x1d9   :  { %v331_v55 = vmax.f32 %v327_v52, 0.0 }
 0x1db   :  { %v332_v56 = vpack.c.bf16 %v331_v55, %v330_v54 }
 0x1dd   :  { %582 = vmatmul.mubr.bf16.vlgmr.msra.gmra.mrb[4].mxu0 %v332_v56 }
 0x2b0   :  { %v438_v58 = vpop.f32.mrb[4].mxu0 }
 0x2b1   :  { %v583_v59 = vpop.f32.mrb[5].mxu0  ;;  %v439_v61 = vadd.f32 %v487_v57, %v438_v58 }
 0x2b2   :  { %v441_v60 = vpop.f32.mrb[6].mxu0 }
 0x2b3   :  { %v442_v62 = vadd.f32 %v487_v57, %v441_v60  ;;  %v584_v63 = vpop.f32.mrb[7].mxu0 }
 0x2b5   :  { %v503_v0 = vpack.c.bf16 %v442_v62, %v439_v61 }
 0x2b7   :  { %504 = vst [vmem:[%s803_s7] sm:$0xff] %v503_v0  }

</bundles_post_ra>
